<compile_context>
chip_gen: v6e
topology: v6e:2x2x1
jax: 0.10.0
libtpu: 0.0.40
codegen_flags: <defaults>
</compile_context>

<pallas_src>
import functools
import math

import numpy as np
import jax
import jax.numpy as jnp
from jax import lax
from jax.experimental import pallas as pl
from jax.experimental.pallas import tpu as pltpu


def _cdiv(a, b):
    return -(-a // b)


def _round_up(a, b):
    return _cdiv(a, b) * b


def _static_int_pow(x, n):
    """x**n for a static non-negative integer n via a VPU multiply chain."""
    assert n >= 0
    result = None
    base = x
    while n > 0:
        if n & 1:
            result = base if result is None else result * base
        n >>= 1
        if n:
            base = base * base
    return jnp.ones_like(x) if result is None else result


def _roll_lanes(v, s):
    """out[..., k] = v[..., (k + s) % W]  (static lane rotation via concat)."""
    w = v.shape[-1]
    s = s % w
    if s == 0:
        return v
    return jnp.concatenate([v[..., s:], v[..., :s]], axis=-1)


def _group_shift(v, j, phase, C):
    """Cyclic shift by +j within each group of C adjacent lanes.

    out[..., k] = v[..., C*(k//C) + ((k % C) + j) % C]
    Requires the lane width W to be a multiple of C so groups never straddle
    a sublane row (guaranteed by W = lcm(128, C)).
    """
    fwd = _roll_lanes(v, j)        # lane k sees lane k + j
    bwd = _roll_lanes(v, j - C)    # lane k sees lane k + j - C
    return jnp.where(phase < (C - j), fwd, bwd)


def _focal_loss_kernel(x_ref, oh_ref, out_ref, *, C, gamma, alpha, total_valid,
                       rowwise, r_blk):
    x = x_ref[...].astype(jnp.float32)        # [R, W] logits, classes interleaved on lanes
    oh = oh_ref[...].astype(jnp.float32)      # [R, W] one-hot of the label lane (0/1)
    R, W = x.shape

    l_iota = lax.broadcasted_iota(jnp.int32, (R, W), 1)
    r_iota = lax.broadcasted_iota(jnp.int32, (R, W), 0)
    phase = l_iota % C                        # class id of each lane (W % C == 0)

    # ---- per-lane softmax probability of the lane's own class ----
    if C == 2:
        # sigmoid specialisation: one exp per lane, no group max / sum passes.
        partner = _group_shift(x, 1, phase, C)          # the other class' logit
        p = 1.0 / (1.0 + jnp.exp(partner - x))          # sigmoid(x - partner)
    else:
        m = x
        for j in range(1, C):
            m = jnp.maximum(m, _group_shift(x, j, phase, C))   # group max
        e = jnp.exp(x - m)
        den = e
        for j in range(1, C):
            den = den + _group_shift(e, j, phase, C)           # group sum
        p = e / den

    # clamp-then-log, exactly like torch.clamp(softmax) -> log
    p = jnp.clip(p, 1e-05, 1.0 - 1e-05)
    logp = jnp.log(p)

    # ---- focal weight (1 - p)^gamma, specialised for integer gamma ----
    g = float(gamma)
    one_minus_p = 1.0 - p                                # >= 1e-5 > 0
    if g == round(g) and g >= 0:
        focal = _static_int_pow(one_minus_p, int(round(g)))    # pure VPU
    else:
        focal = jnp.exp(g * jnp.log(one_minus_p))

    # ---- per-class alpha baked in as compile-time constants ----
    alpha_lane = jnp.full((R, W), alpha[0], dtype=jnp.float32)
    for c in range(1, C):
        alpha_lane = jnp.where(phase == c, alpha[c], alpha_lane)

    loss = -(alpha_lane * oh) * focal * logp        # nonzero only at label lanes

    # Mask padded / partial-trailing-block lanes.  Select-based, so Inf/NaN
    # from garbage in the tail never propagates into the reduction.
    flat_idx = (pl.program_id(0) * r_blk + r_iota) * W + l_iota
    loss = jnp.where(flat_idx < total_valid, loss, 0.0)

    if rowwise:                                     # reduction='none'
        out_ref[...] = loss                         # dense lane-aligned slab
    else:                                           # 'sum' / 'mean'
        out_ref[...] = jnp.sum(loss).reshape(1, 1, 1)   # per-tile partial sum


def focal_loss(preds_labels, labels, *, alpha=0.2, num_classes=2, gamma=2.0,
               reduction="sum", rows_per_tile=None):
    """JAX/Pallas equivalent of FocalLoss.forward.

    preds_labels: [B, N, C] or [B, C] logits (any float dtype; cast in-kernel)
    labels:       [B, N]    or [B]    integer class ids (assumed in-range)
    """
    C = preds_labels.shape[-1]
    assert C == num_classes
    M = int(np.prod(preds_labels.shape[:-1]))
    assert int(np.prod(labels.shape)) == M

    # alpha vector: [alpha, 1-alpha, 1-alpha, ...] (torch semantics),
    # compile-time Python floats (no alpha operand / DMA).
    if isinstance(alpha, (list, tuple)):
        assert len(alpha) == num_classes
        alpha_vec = tuple(float(a) for a in alpha)
    else:
        assert alpha < 1
        alpha_vec = (float(alpha),) + (1.0 - float(alpha),) * (num_classes - 1)

    # Lane-dense slab layout: W = lcm(128, C) lanes / slab row,
    # RPB = W // C original rows per slab row (<= 128).
    W = (128 * C) // math.gcd(128, C)
    RPB = W // C

    m_pad = max(_round_up(M, RPB), 16 * RPB)   # >= 16 slab rows (bf16 tiling)
    n_rows = m_pad // RPB

    preds_flat = preds_labels.reshape(-1)      # natural flat order (free reshape)
    labels_flat = labels.reshape(-1).astype(jnp.int32)
    if m_pad != M:
        # Only misaligned / tiny inputs pay this single dense pad (a rectangular
        # lane-dense view of the full array does not exist otherwise); aligned
        # inputs pass through copy-free and the kernel's flat-index mask handles
        # the partial trailing block.
        preds_flat = jnp.pad(preds_flat, (0, (m_pad - M) * C))
        labels_flat = jnp.pad(labels_flat, (0, m_pad - M), constant_values=-1)
    preds_slab = preds_flat.reshape(n_rows, W)

    # bf16 one-hot slab, lane-aligned with the logits: replaces the in-kernel
    # label compare and the alpha gather.  Out-of-range labels -> all-zero
    # row -> zero loss (labels assumed valid, same behavior as before).
    onehot_slab = (labels_flat[:, None] ==
                   jnp.arange(C, dtype=jnp.int32)[None, :]
                   ).astype(jnp.bfloat16).reshape(n_rows, W)

    # Tile sizing: large tiles (up to ~128K rows / step) to amortise per-step
    # overhead, >= 2 (typically ~8) grid steps for megacore sharding on v7x,
    # block sublanes a multiple of 16 (bf16-friendly).
    cap = max(16, ((131072 // RPB) // 16) * 16)
    if rows_per_tile is None:
        r_blk = max(16, min(cap, _round_up(_cdiv(n_rows, 8), 16)))
    else:
        r_blk = max(16, min(cap, _round_up(max(1, rows_per_tile // RPB), 16)))
    num_tiles = _cdiv(n_rows, r_blk)

    rowwise = reduction == "none"
    kernel = functools.partial(
        _focal_loss_kernel, C=C, gamma=float(gamma), alpha=alpha_vec,
        total_valid=M * C, rowwise=rowwise, r_blk=r_blk)

    if rowwise:
        out_shape = jax.ShapeDtypeStruct((n_rows, W), jnp.float32)
        out_spec = pl.BlockSpec((r_blk, W), lambda i: (i, 0))
        out_bytes = n_rows * W * 4
    else:
        out_shape = jax.ShapeDtypeStruct((num_tiles, 1, 1), jnp.float32)
        out_spec = pl.BlockSpec((1, 1, 1), lambda i: (i, 0, 0))
        out_bytes = num_tiles * 4

    n_elems = n_rows * W
    g_int = float(gamma) == round(float(gamma)) and gamma >= 0
    cost = pl.CostEstimate(
        flops=30 * n_elems,
        transcendentals=(3 if g_int else 5) * n_elems,
        bytes_accessed=n_elems * preds_slab.dtype.itemsize   # logits slab
                       + n_elems * 2                         # bf16 one-hot slab
                       + out_bytes)

    out = pl.pallas_call(
        kernel,
        out_shape=out_shape,
        grid_spec=pl.GridSpec(
            grid=(num_tiles,),
            in_specs=[
                pl.BlockSpec((r_blk, W), lambda i: (i, 0)),   # logits slab
                pl.BlockSpec((r_blk, W), lambda i: (i, 0)),   # one-hot slab
            ],
            out_specs=out_spec,
        ),
        compiler_params=pltpu.CompilerParams(
            dimension_semantics=("parallel",)),   # shards tiles across TCs (v7x)
        cost_estimate=cost,
    )(preds_slab, onehot_slab)

    if rowwise:
        # One nonzero lane per row -> per-row loss; matches torch's [1, M].
        row_loss = out.reshape(m_pad, C).sum(axis=1)[:M]
        return row_loss.reshape(1, M)
    loss_sum = jnp.sum(out)                    # tiny final reduce over tiles
    if reduction == "mean":
        return loss_sum / jnp.float32(M)
    return loss_sum                            # 'sum' (module default)


def _reference(preds_labels, labels, *, alpha=0.2, num_classes=2, gamma=2.0,
               reduction="sum"):
    # pure-JAX reference mirroring the PyTorch forward
    C = preds_labels.shape[-1]
    preds = preds_labels.reshape(-1, C).astype(jnp.float32)
    lab = labels.reshape(-1).astype(jnp.int32)
    if isinstance(alpha, (list, tuple)):
        a = jnp.asarray(alpha, dtype=jnp.float32)
    else:
        a = jnp.full((num_classes,), 1.0 - alpha, jnp.float32).at[0].set(alpha)
    p = jax.nn.softmax(preds, axis=1)
    p = jnp.clip(p, 1e-05, 1.0 - 1e-05)
    lp = jnp.log(p)
    p_t = jnp.take_along_axis(p, lab[:, None], axis=1)[:, 0]
    lp_t = jnp.take_along_axis(lp, lab[:, None], axis=1)[:, 0]
    a_t = a[lab]
    loss = -a_t * (1.0 - p_t) ** gamma * lp_t
    if reduction == "mean":
        return jnp.mean(loss)
    if reduction == "sum":
        return jnp.sum(loss)
    return loss


if __name__ == "__main__":
    key = jax.random.PRNGKey(0)
    k1, k2, k3, k4, k5, k6 = jax.random.split(key, 6)

    # Case 1: C=2 detection-style logits, aligned M (copy-free slab), 2 grid
    # steps, reduction='sum' (module default).
    B, N, C = 2, 1024, 2
    preds = jax.random.normal(k1, (B, N, C), dtype=jnp.float32)
    labels = jax.random.randint(k2, (B, N), 0, C, dtype=jnp.int32)
    out = jax.block_until_ready(
        focal_loss(preds, labels, alpha=0.2, num_classes=C, gamma=2.0,
                   reduction="sum"))
    ref = _reference(preds, labels, alpha=0.2, num_classes=C, gamma=2.0)
    assert jnp.allclose(out, ref, rtol=1e-5, atol=1e-5), (out, ref)

    # Case 1b: reduction='none' -> per-row losses with torch's [1, M] shape.
    out_none = jax.block_until_ready(
        focal_loss(preds, labels, alpha=0.2, num_classes=C, gamma=2.0,
                   reduction="none"))
    ref_none = _reference(preds, labels, alpha=0.2, num_classes=C, gamma=2.0,
                          reduction="none")
    assert out_none.shape == (1, B * N)
    assert jnp.allclose(out_none[0], ref_none, rtol=1e-5, atol=1e-5)

    # Case 2: C=3, misaligned M (minimal pad + partial trailing block), list
    # alpha, non-integer gamma, reduction='mean', multi-tile grid.
    B2, N2, C2 = 2, 1100, 3
    preds2 = jax.random.normal(k3, (B2, N2, C2), dtype=jnp.float32)
    labels2 = jax.random.randint(k4, (B2, N2), 0, C2, dtype=jnp.int32)
    out2 = jax.block_until_ready(
        focal_loss(preds2, labels2, alpha=[0.2, 0.3, 0.5], num_classes=C2,
                   gamma=1.5, reduction="mean"))
    ref2 = _reference(preds2, labels2, alpha=[0.2, 0.3, 0.5], num_classes=C2,
                      gamma=1.5, reduction="mean")
    assert jnp.allclose(out2, ref2, rtol=1e-5, atol=1e-5), (out2, ref2)

    # Case 3: tiny classification-style [B, C] input (single padded tile).
    B3, C3 = 16, 2
    preds3 = jax.random.normal(k5, (B3, C3), dtype=jnp.float32)
    labels3 = jax.random.randint(k6, (B3,), 0, C3, dtype=jnp.int32)
    out3 = jax.block_until_ready(
        focal_loss(preds3, labels3, alpha=0.2, num_classes=C3, gamma=2.0,
                   reduction="sum"))
    ref3 = _reference(preds3, labels3, alpha=0.2, num_classes=C3, gamma=2.0)
    assert jnp.allclose(out3, ref3, rtol=1e-5, atol=1e-5), (out3, ref3)

    print("KERNEL_OK")
</pallas_src>

<mosaic_0001>
module attributes {stable_mosaic.version = 11 : i64} {
  func.func @_focal_loss_kernel(%arg0: i32, %arg1: memref<16x128xf32, #tpu.memory_space<vmem>>, %arg2: memref<16x128xbf16, #tpu.memory_space<vmem>>, %arg3: memref<1x1x1xf32, #tpu.memory_space<vmem>>) attributes {dimension_semantics = [#tpu.dimension_semantics<parallel>], iteration_bounds = array<i64: 2>, scalar_prefetch = 0 : i64, scratch_operands = 0 : i64, tpu.core_type = #tpu.core_type<tc>, window_params = [{transform_indices = @transform_0, window_bounds = array<i64: 16, 128>}, {transform_indices = @transform_1, window_bounds = array<i64: 16, 128>}, {transform_indices = @transform_2, window_bounds = array<i64: 1, 1, 1>}]} {
    %c0 = arith.constant 0 : index
    %c0_0 = arith.constant 0 : index
    %0 = vector.load %arg1[%c0, %c0_0] : memref<16x128xf32, #tpu.memory_space<vmem>>, vector<16x128xf32>
    %c0_1 = arith.constant 0 : index
    %c0_2 = arith.constant 0 : index
    %1 = vector.load %arg2[%c0_1, %c0_2] : memref<16x128xbf16, #tpu.memory_space<vmem>>, vector<16x128xbf16>
    %2 = arith.extf %1 : vector<16x128xbf16> to vector<16x128xf32>
    %3 = tpu.iota {dimensions = array<i32: 1>} : vector<16x128xi32>
    %4 = tpu.iota {dimensions = array<i32: 0>} : vector<16x128xi32>
    %c2_i32 = arith.constant 2 : i32
    %c0_i32 = arith.constant 0 : i32
    %5 = arith.cmpi eq, %c2_i32, %c0_i32 : i32
    %c1_i32 = arith.constant 1 : i32
    %6 = arith.select %5, %c1_i32, %c2_i32 : i32
    %7 = vector.broadcast %6 : i32 to vector<16x128xi32>
    %8 = arith.remsi %3, %7 : vector<16x128xi32>
    %c0_i32_3 = arith.constant 0 : i32
    %9 = vector.broadcast %c0_i32_3 : i32 to vector<16x128xi32>
    %10 = arith.cmpi ne, %8, %9 : vector<16x128xi32>
    %c0_i32_4 = arith.constant 0 : i32
    %11 = vector.broadcast %c0_i32_4 : i32 to vector<16x128xi32>
    %12 = arith.cmpi slt, %8, %11 : vector<16x128xi32>
    %c0_i32_5 = arith.constant 0 : i32
    %13 = arith.cmpi slt, %6, %c0_i32_5 : i32
    %14 = vector.broadcast %13 : i1 to vector<16x128xi1>
    %15 = vector.broadcast %14 : vector<16x128xi1> to vector<16x128xi1>
    %16 = arith.xori %12, %15 : vector<16x128xi1>
    %17 = arith.andi %16, %10 : vector<16x128xi1>
    %18 = vector.broadcast %6 : i32 to vector<16x128xi32>
    %19 = arith.addi %8, %18 : vector<16x128xi32>
    %20 = arith.select %17, %19, %8 : vector<16x128xi1>, vector<16x128xi32>
    %21 = vector.extract_strided_slice %0 {offsets = [0, 1], sizes = [16, 127], strides = [1, 1]} : vector<16x128xf32> to vector<16x127xf32>
    %22 = vector.extract_strided_slice %0 {offsets = [0, 0], sizes = [16, 1], strides = [1, 1]} : vector<16x128xf32> to vector<16x1xf32>
    %23 = tpu.concatenate %21, %22 in 1 : vector<16x127xf32>, vector<16x1xf32> -> vector<16x128xf32>
    %24 = vector.extract_strided_slice %0 {offsets = [0, 127], sizes = [16, 1], strides = [1, 1]} : vector<16x128xf32> to vector<16x1xf32>
    %25 = vector.extract_strided_slice %0 {offsets = [0, 0], sizes = [16, 127], strides = [1, 1]} : vector<16x128xf32> to vector<16x127xf32>
    %26 = tpu.concatenate %24, %25 in 1 : vector<16x1xf32>, vector<16x127xf32> -> vector<16x128xf32>
    %c1_i32_6 = arith.constant 1 : i32
    %27 = vector.broadcast %c1_i32_6 : i32 to vector<16x128xi32>
    %28 = arith.cmpi slt, %20, %27 : vector<16x128xi32>
    %29 = arith.select %28, %23, %26 : vector<16x128xi1>, vector<16x128xf32>
    %30 = arith.subf %29, %0 : vector<16x128xf32>
    %31 = math.exp %30 : vector<16x128xf32>
    %cst = arith.constant 1.000000e+00 : f32
    %32 = vector.broadcast %cst : f32 to vector<16x128xf32>
    %33 = arith.addf %32, %31 : vector<16x128xf32>
    %cst_7 = arith.constant 1.000000e+00 : f32
    %34 = vector.broadcast %cst_7 : f32 to vector<16x128xf32>
    %35 = arith.divf %34, %33 : vector<16x128xf32>
    %cst_8 = arith.constant 9.99999974E-6 : f32
    %cst_9 = arith.constant 0.999989986 : f32
    %36 = vector.broadcast %cst_8 : f32 to vector<16x128xf32>
    %37 = arith.maximumf %36, %35 : vector<16x128xf32>
    %38 = vector.broadcast %cst_9 : f32 to vector<16x128xf32>
    %39 = arith.minimumf %38, %37 : vector<16x128xf32>
    %40 = math.log %39 : vector<16x128xf32>
    %cst_10 = arith.constant 1.000000e+00 : f32
    %41 = vector.broadcast %cst_10 : f32 to vector<16x128xf32>
    %42 = arith.subf %41, %39 : vector<16x128xf32>
    %43 = arith.mulf %42, %42 : vector<16x128xf32>
    %cst_11 = arith.constant 2.000000e-01 : f32
    %44 = vector.broadcast %cst_11 : f32 to vector<16x128xf32>
    %c1_i32_12 = arith.constant 1 : i32
    %45 = vector.broadcast %c1_i32_12 : i32 to vector<16x128xi32>
    %46 = arith.cmpi eq, %20, %45 : vector<16x128xi32>
    %cst_13 = arith.constant 8.000000e-01 : f32
    %47 = vector.broadcast %cst_13 : f32 to vector<16x128xf32>
    %48 = arith.select %46, %47, %44 : vector<16x128xi1>, vector<16x128xf32>
    %49 = arith.mulf %48, %2 : vector<16x128xf32>
    %cst_14 = arith.constant 0.000000e+00 : f32
    %50 = vector.broadcast %cst_14 : f32 to vector<16x128xf32>
    %51 = arith.subf %50, %49 : vector<16x128xf32>
    %52 = arith.mulf %51, %43 : vector<16x128xf32>
    %53 = arith.mulf %52, %40 : vector<16x128xf32>
    %c16_i32 = arith.constant 16 : i32
    %54 = arith.muli %arg0, %c16_i32 : i32
    %55 = vector.broadcast %54 : i32 to vector<16x128xi32>
    %56 = arith.addi %55, %4 : vector<16x128xi32>
    %c128_i32 = arith.constant 128 : i32
    %57 = vector.broadcast %c128_i32 : i32 to vector<16x128xi32>
    %58 = arith.muli %56, %57 : vector<16x128xi32>
    %59 = arith.addi %58, %3 : vector<16x128xi32>
    %c4096_i32 = arith.constant 4096 : i32
    %60 = vector.broadcast %c4096_i32 : i32 to vector<16x128xi32>
    %61 = arith.cmpi slt, %59, %60 : vector<16x128xi32>
    %cst_15 = arith.constant 0.000000e+00 : f32
    %62 = vector.broadcast %cst_15 : f32 to vector<16x128xf32>
    %63 = arith.select %61, %53, %62 : vector<16x128xi1>, vector<16x128xf32>
    %64 = vector.shape_cast %63 : vector<16x128xf32> to vector<1x16x128xf32>
    %cst_16 = arith.constant dense<0.000000e+00> : vector<1xf32>
    %65 = vector.multi_reduction <add>, %64, %cst_16 [1, 2] : vector<1x16x128xf32> to vector<1xf32>
    %66 = vector.shape_cast %65 : vector<1xf32> to vector<1x1x1xf32>
    %67 = vector.extract %66[0, 0, 0] : f32 from vector<1x1x1xf32>
    %68 = vector.broadcast %67 : f32 to vector<1x1x1xf32>
    %c0_17 = arith.constant 0 : index
    %c0_18 = arith.constant 0 : index
    %c0_19 = arith.constant 0 : index
    %69 = vector.load %arg3[%c0_17, %c0_18, %c0_19] : memref<1x1x1xf32, #tpu.memory_space<vmem>>, vector<1x1x1xf32>
    tpu.vector_store %arg3[%c0_17, %c0_18, %c0_19], %68 {strides = array<i32>} : memref<1x1x1xf32, #tpu.memory_space<vmem>>, vector<1x1x1xf32>,
    return
  }
  func.func @transform_0(%arg0: i32) -> (i32, i32) {
    %c0_i32 = arith.constant 0 : i32
    %c0_i32_0 = arith.constant 0 : i32
    return %arg0, %c0_i32 : i32, i32
  }
  func.func @transform_1(%arg0: i32) -> (i32, i32) {
    %c0_i32 = arith.constant 0 : i32
    %c0_i32_0 = arith.constant 0 : i32
    return %arg0, %c0_i32 : i32, i32
  }
  func.func @transform_2(%arg0: i32) -> (i32, i32, i32) {
    %c0_i32 = arith.constant 0 : i32
    %c0_i32_0 = arith.constant 0 : i32
    %c0_i32_1 = arith.constant 0 : i32
    return %arg0, %c0_i32, %c0_i32_0 : i32, i32, i32
  }
}

</mosaic_0001>

<bundles_post_ra>
// kernel: tpu_custom_call.1
= control target key start
LH: loop header
LB: loop body
LE: loop exit
PB: predicated region body
PF: predicated region fallthrough
CT: control target
= control target key end

     0   :  { %7 = vsyncpa [#allocation3], 0  ;;  %s747_s0 = inlined_call_operand.hbm [shape: f32[32,128], index: 0, kind: input, shape index: {}]   ;;  %s748_s1 = inlined_call_operand.hbm [shape: bf16[32,128], index: 1, kind: input, shape index: {}]   ;;  %s749_s2 = inlined_call_operand.vmem [shape: f32[2,1,1], index: 2, kind: output, shape index: {}]  }
   0x1   :  { %9 = vsyncpa [#allocation3 + $0x1], 0 }
   0x2   :  { %10 = vsyncpa [#allocation5], 0 }
   0x3   :  { %12 = vsyncpa [#allocation5 + $0x1], 0  ;;  %s589_s9 = smov 0   ;;  %s591_s10 = smov 0  }
   0x4   :  { %s593_s11 = smov 0   ;;  %s595_s12 = smov 0  }
   0x5 LB: > { %s608_s13 = sadd.s32 4294967295, %s563_s12   ;;  %s611_s14 = sadd.s32 1, %s563_s12   ;;  %s563_s12 = sphi %s595_s12, %s759_s12   ;;  %s559_s11 = sphi %s593_s11, %s758_s11   ;;  %s555_s10 = sphi %s591_s10, %s757_s10   ;;  %s551_s9 = sphi %s589_s9, %s756_s9  }
   0x6   : > { %s22_s15 = ssub.s32 %s563_s12, %s611_s14  ;;  %s25_s16 = sadd.s32 1, %s559_s11 }
   0x7   : > { %p23_p0 = scmp.eq.s32.totalorder %s22_s15, 0  ;;  %p32_p1 = scmp.ne.s32.totalorder %s559_s11, %s555_s10 }
   0x8   : > { %p33_p2 = scmp.eq.s32.totalorder %s563_s12, 0  ;;  %p38_p3 = scmp.ne.s32.totalorder %s555_s10, %s551_s9 }
   0x9   : > { %s621_s17 = scalar_select %p23_p0, %s559_s11, %s25_s16  }
   0xa   : > { %p34_p4 = por %p33_p2, %p32_p1  ;;  %p39_p5 = scmp.eq.s32.totalorder %s608_s13, 0 }
   0xb   : > { %p417_p6 = scmp.lt.s32.totalorder %s563_s12, 2  ;;  %s630_s19 = sand.u32 1, %s559_s11  }
   0xc   : > { %p625_p7 = por %p39_p5, %p38_p3  ;;  %s386_s20 = sshll.u32 %s630_s19, 4 }
   0xd   : > { %s398_s21 = sshll.u32 %s563_s12, 8  ;;  %s118_s25 = scalar_lea.vmem [#allocation2], %s386_s20 }
   0xe   : > { %s751_s18 = scalar_select %p625_p7, 1, 0 }
   0xf   : > { %s637_s24 = scalar_lea.hbm %s747_s0, %s398_s21  ;;  %s125_s26 = sshll.u32 %s118_s25, 4  ;;  %s639_s26 = int_to_ptr.vmem [resolvable:$true] %s125_s26 }
  0x10   : > { %p641_p8 = pnand %p417_p6, %p34_p4  ;;  %s115_s28 = scalar_lea.sflag [#allocation3], %s630_s19 }
  0x11   : > { %s469_s29 = scalar_lea.hbm %s637_s24, 256  ;;  %s474_s4 = scalar_lea.hbm %s747_s0, 512 }
  0x12   : > { %p470_p10 = scmp.ne.s32.totalorder %s637_s24, %s469_s29  ;;  %p471_p11 = pneg %p641_p8 }
  0x13   : > { %p475_p0 = scmp.lt.s32.totalorder %s637_s24, %s747_s0  ;;  %p476_p1 = scmp.lt.s32.totalorder %s474_s4, %s469_s29 }
  0x14   : > { %p472_p12 = pnand %p471_p11, %p470_p10 }
  0x15   : > { %p477_p2 = por %p476_p1, %p475_p0 }
  0x16   : > { %p473_p13 = pneg %p472_p12 }
  0x18   : > { %p478_p3 = pnand %p477_p2, %p473_p13 }
  0x1a   : > { %481 = shalt.err (!%p478_p3)
}
  0x1b   : > { %s482_s7 = scalar_lea.vmem %s639_s26, 256  ;;  %s565_s8 = smov [#allocation2]  }
  0x1c   : > { %p483_p4 = scmp.ne.s32.totalorder %s639_s26, %s482_s7  ;;  %s487_s9 = sshll.u32 %s565_s8, 4  ;;  %s488_s9 = int_to_ptr.vmem [resolvable:$false] %s487_s9 }
  0x1d   : > { %s489_s15 = scalar_lea.vmem %s488_s9, 512  ;;  %p490_p10 = scmp.lt.s32.totalorder %s639_s26, %s488_s9 }
  0x1e   : > { %p485_p5 = pnand %p483_p4, %p471_p11  ;;  %p491_p12 = scmp.lt.s32.totalorder %s489_s15, %s482_s7 }
  0x20   : > { %p486_p6 = pneg %p485_p5  ;;  %p492_p9 = por %p491_p12, %p490_p10 }
  0x22   : > { %p493_p0 = pnand %p492_p9, %p486_p6 }
  0x24   : > { %496 = shalt.err (!%p493_p0)
}
  0x25   : > { %s566_s16 = smov 128   ;;  %s567_s20 = smov 8  }
  0x26   : > { %413 = dma.hbm_to_vmem [thread:$0]  (!%p641_p8), %s637_s24, 256, %s639_s26, %s115_s28, %s566_s16, %s566_s16, %s567_s20  }
  0x27   : > { %p154_p13 = scmp.lt.s32.totalorder %s563_s12, 3  ;;  %s389_s21 = sshll.u32 %s630_s19, 3 }
  0x28   : > { %s399_s22 = sshll.u32 %s563_s12, 7  ;;  %p753_p9 = scmp.ge.s32.totalorder %s563_s12, 1 }
  0x29   : > { %s685_s30 = scalar_lea.hbm %s748_s1, %s399_s22  ;;  %s139_s3 = scalar_lea.vmem [#allocation4], %s389_s21 }
  0x2a   : > { %p678_p1 = pnand %p753_p9, %p154_p13  ;;  %s146_s4 = sshll.u32 %s139_s3, 4  ;;  %s687_s4 = int_to_ptr.vmem [resolvable:$true] %s146_s4 }
  0x2b   : > { %s136_s24 = scalar_lea.sflag [#allocation5], %s630_s19  ;;  %s497_s26 = scalar_lea.hbm %s685_s30, 128 }
  0x2c   : > { %p498_p2 = scmp.ne.s32.totalorder %s685_s30, %s497_s26  ;;  %s502_s5 = scalar_lea.hbm %s748_s1, 256 }
  0x2d   : > { %p503_p5 = scmp.lt.s32.totalorder %s685_s30, %s748_s1  ;;  %p504_p6 = scmp.lt.s32.totalorder %s502_s5, %s497_s26 }
  0x2e   : > { %p500_p3 = pnand %p498_p2, %p471_p11 }
  0x2f   : > { %p505_p10 = por %p504_p6, %p503_p5 }
  0x30   : > { %p501_p4 = pneg %p500_p3 }
  0x32   : > { %p506_p12 = pnand %p505_p10, %p501_p4 }
  0x34   : > { %509 = shalt.err (!%p506_p12)
}
  0x35   : > { %s510_s8 = scalar_lea.vmem %s687_s4, 128  ;;  %s568_s9 = smov [#allocation4]  }
  0x36   : > { %p511_p0 = scmp.ne.s32.totalorder %s687_s4, %s510_s8  ;;  %s515_s15 = sshll.u32 %s568_s9, 4  ;;  %s516_s15 = int_to_ptr.vmem [resolvable:$false] %s515_s15 }
  0x37   : > { %s517_s16 = scalar_lea.vmem %s516_s15, 256  ;;  %p518_p2 = scmp.lt.s32.totalorder %s687_s4, %s516_s15 }
  0x38   : > { %p513_p13 = pnand %p511_p0, %p471_p11  ;;  %p519_p3 = scmp.lt.s32.totalorder %s517_s16, %s510_s8 }
  0x3a   : > { %p514_p9 = pneg %p513_p13  ;;  %p520_p7 = por %p519_p3, %p518_p2 }
  0x3c   : > { %p521_p5 = pnand %p520_p7, %p514_p9 }
  0x3e   : > { %524 = shalt.err (!%p521_p5)
}
  0x3f   : > { %s569_s20 = smov 64   ;;  %s570_s21 = smov 4  }
  0x40   : > { %416 = dma.hbm_to_vmem [thread:$0]  (!%p641_p8), %s685_s30, 128, %s687_s4, %s136_s24, %s569_s20, %s569_s20, %s570_s21  }
  0x41   : > { %158 = sbr.rel (%p678_p1) target bundleno = 456 (0x1c8), region = 28  ;;  %s160_s22 = sand.u32 (!%p678_p1), 1, %s555_s10  }
  0x42   : > { %s393_s25 = sshll.u32 (!%p678_p1), %s160_s22, 4  ;;  %s161_s29 = scalar_lea.sflag (!%p678_p1), [#allocation3], %s160_s22 }
  0x43   : > { %s164_s3 = scalar_lea.vmem (!%p678_p1), [#allocation2], %s393_s25  ;;  %p755_p7 = scmp.ne.s32.totalorder (!%p678_p1), %s751_s18, 0 }
  0x46   : > { %542 = dma.done.wait (%p755_p7), %s161_s29, 256  }
  0x47   : > { %544 = vsyncadd (%p755_p7), %s161_s29, 4294967040  ;;  %s394_s26 = sshll.u32 %s160_s22, 3  ;;  %s170_s12 = scalar_lea.sflag [#allocation5], %s160_s22 }
  0x48   : > { %s721_s27 = scalar_lea.vmem [#allocation4], %s394_s26 }
  0x49   : > { %546 = dma.done.wait (%p755_p7), %s170_s12, 128  }
  0x4a   : > { %548 = vsyncadd (%p755_p7), %s170_s12, 4294967168  ;;  %v202_v0 = vld [vmem:[%s164_s3] sm:$0xff]  ;;  %s571_s19 = smov 1   ;;  %s572_s23 = smov 127   ;;  %v203_v1 = vld [vmem:[%s164_s3 + $0x8] sm:$0xff]  ;;  %v208_v2 = vlaneseq  ;;  %vm299_vm4 = vcmask 0  }
  0x4b   : > { %233 = vrot.lane.b32.xlu1 %v202_v0, %s571_s19  ;;  %227 = vrot.lane.b32.xlu0 %v202_v0, %s572_s23  ;;  %v401_v24 = vld [vmem:[%s721_s27] sm:$0xff]   ;;  %s395_s18 = sshll.u32 %s608_s13, 4  ;;  %v573_v30 = vmov 0.2   ;;  %p199_p8 = scmp.lt.s32.totalorder %s608_s13, 1 }
  0x4c   : > { %v209_v3 = vand.u32 127, %v208_v2  ;;  %v211_v25 = vshrl.u32 %v208_v2, 7  ;;  %v402_v28 = vunpack.c.l.bf16 %v401_v24  ;;  %v277_v29 = vstv %s395_s18 }
  0x4d   : > { %v403_v32 = vunpack.c.h.bf16 %v401_v24  ;;  %s761_s13 = smov (!%p199_p8, %s608_s13), 1 }
  0x4e   : > { %v217_v4 = vand.u32 1, %v209_v3  ;;  %v212_v27 = vadd.s32 8, %v211_v25  ;;  %v278_v33 = vadd.s32 %v277_v29, %v211_v25  ;;  %s201_s24 = scalar_lea.vmem %s749_s2, %s761_s13 }
  0x4f   : > { %235 = vrot.lane.b32.xlu1 %v203_v1, %s571_s19  ;;  %229 = vrot.lane.b32.xlu0 %v203_v1, %s572_s23 }
  0x50   : > { %vm239_vm0 = vcmp.lt.s32.totalorder %v217_v4, 1  ;;  %vm266_vm1 = vcmp.eq.s32.totalorder %v217_v4, 1  ;;  %v279_v34 = vadd.s32 %v277_v29, %v212_v27  ;;  %v280_v39 = vmul.u32 128, %v278_v33 }
  0x51   : > { %v267_v31 = vsel %vm266_vm1, 0.8, %v573_v30 }
  0x52   : > { %v268_v36 = vmul.f32 %v402_v28, %v267_v31  ;;  %v269_v38 = vmul.f32 %v403_v32, %v267_v31  ;;  %v281_v40 = vmul.u32 128, %v279_v34  ;;  %v282_v47 = vadd.s32 %v280_v39, %v209_v3 }
  0x54   : > { %v270_v42 = vsub.f32 0.0, %v268_v36  ;;  %v271_v46 = vsub.f32 0.0, %v269_v38  ;;  %v283_v48 = vadd.s32 %v281_v40, %v209_v3  ;;  %vm284_vm2 = vcmp.lt.s32.totalorder %v282_v47, 4096 }
  0x56   : > { %vm285_vm3 = vcmp.lt.s32.totalorder %v283_v48, 4096 }
  0xbd   : > { %v234_v5 = vpop.permute.xlu1 %233  ;;  %v228_v6 = vpop.permute.xlu0 %227 }
  0xbe   : > { %v240_v7 = vsel %vm239_vm0, %v228_v6, %v234_v5 }
  0xbf   : > { %v242_v8 = vsub.f32 %v240_v7, %v202_v0 }
  0xc1   : > { %v244_v9 = vmul.f32 1.442695, %v242_v8  ;;  %v236_v10 = vpop.permute.xlu1 %235  ;;  %v230_v11 = vpop.permute.xlu0 %229 }
  0xc2   : > { %v241_v12 = vsel %vm239_vm0, %v230_v11, %v236_v10 }
  0xc3   : > { %457 = vpow2.f32 %v244_v9  ;;  %v243_v13 = vsub.f32 %v241_v12, %v203_v1 }
  0xc5   : > { %v246_v14 = vmul.f32 1.442695, %v243_v13 }
  0xc7   : > { %459 = vpow2.f32 %v246_v14 }
  0xd0   : > { %v458_v15 = vpop.eup %457 }
  0xd1   : > { %v248_v16 = vadd.f32 1.0, %v458_v15 }
  0xd3   : > { %461 = vrcp.f32 %v248_v16 }
  0xd4   : > { %v460_v17 = vpop.eup %459 }
  0xd5   : > { %v249_v18 = vadd.f32 1.0, %v460_v17 }
  0xd7   : > { %463 = vrcp.f32 %v249_v18 }
  0xe0   : > { %v462_v19 = vpop.eup %461 }
  0xe1   : > { %v254_v20 = vmax.f32 %v462_v19, 1e-05 }
  0xe3   : > { %v256_v21 = vmin.f32 %v254_v20, 0.99999 }
  0xe4   : > { %v464_v22 = vpop.eup %463 }
  0xe5   : > { %v255_v23 = vmax.f32 %v464_v22, 1e-05  ;;  %465 = vlog2.f32 %v256_v21  ;;  %v262_v35 = vsub.f32 1.0, %v256_v21 }
  0xe7   : > { %v257_v26 = vmin.f32 %v255_v23, 0.99999  ;;  %v264_v41 = vmul.f32 %v262_v35, %v262_v35 }
  0xe9   : > { %467 = vlog2.f32 %v257_v26  ;;  %v263_v37 = vsub.f32 1.0, %v257_v26  ;;  %v272_v49 = vmul.f32 %v270_v42, %v264_v41 }
  0xeb   : > { %v265_v45 = vmul.f32 %v263_v37, %v263_v37 }
  0xed   : > { %v273_v52 = vmul.f32 %v271_v46, %v265_v45 }
  0xf2   : > { %v466_v43 = vpop.eup %465 }
  0xf3   : > { %v259_v44 = vmul.f32 0.6931472, %v466_v43 }
  0xf5   : > { %v274_v53 = vmul.f32 %v272_v49, %v259_v44 }
  0xf6   : > { %v468_v50 = vpop.eup %467 }
  0xf7   : > { %v261_v51 = vmul.f32 0.6931472, %v468_v50  ;;  %v286_v55 = vsel %vm284_vm2, %v274_v53, 0.0 }
  0xf9   : > { %v275_v54 = vmul.f32 %v273_v52, %v261_v51 }
  0xfb   : > { %v287_v56 = vsel %vm285_vm3, %v275_v54, 0.0 }
  0xfc   : > { %v288_v57 = vadd.f32 %v287_v56, %v286_v55 }
  0xfe   : > { %289 = vadd.xlane.f32.xlu0 %v288_v57 }
 0x187   : > { %v290_v58 = vpop.xlane.xlu0 %289 }
 0x188   : > { %v291_v59 = vrot.slane %v290_v58, 4 }
 0x18a   : > { %v292_v60 = vadd.f32 %v291_v59, %v290_v58 }
 0x18c   : > { %v293_v61 = vrot.slane %v292_v60, 2 }
 0x18e   : > { %v294_v62 = vadd.f32 %v293_v61, %v292_v60 }
 0x190   : > { %v295_v63 = vrot.slane %v294_v62, 1 }
 0x192   : > { %v296_v0 = vadd.f32 %v295_v63, %v294_v62 }
 0x194   : > { %404 = vpush %v296_v0 }
 0x1c5   : > { %s405_s28 = spop %404 }
 0x1c6   : > { %v298_v1 = vstv %s405_s28 }
 0x1c7   : > { %300 = vst.msk [vmem:[%s201_s24] sm:$0x1] %vm299_vm4, %v298_v1 }
 0x1c8 PF: > { %p15_p11 = scmp.ge.s32.totalorder %s611_s14, 4   ;;  %s756_s9 = smov %s555_s10 }
 0x1c9   : > { %s757_s10 = smov %s559_s11  ;;  %s758_s11 = smov %s621_s17 }
 0x1ca   : > { %s759_s12 = smov %s611_s14  ;;  %17 = sbr.rel (!%p15_p11) target bundleno = 5 (0x5), region = 81 }
 0x1cf   :  { %318 = vsyncpa [#allocation3], 1 }
 0x1d0   :  { %320 = vsyncpa [#allocation3 + $0x1], 1 }
 0x1d1   :  { %321 = vsyncpa [#allocation5], 1 }
 0x1d2   :  { %323 = vsyncpa [#allocation5 + $0x1], 1 }

</bundles_post_ra>
